<compile_context>
chip_gen: v5e
topology: v5e:2x2
jax: 0.10.0
libtpu: 0.0.40
codegen_flags: <defaults>
</compile_context>

<pallas_src>
import jax
import jax.numpy as jnp
from jax.experimental import pallas as pl
from jax.experimental.pallas import tpu as pltpu

INPUT_SIZE = 21 * 3 * 2      # 126
HIDDEN_SIZE = 64
NUM_CLASSES = 24
TB_MAX = 4096                # batch-tile upper bound (well under all VMEM limits)


def mlp_kernel(x_ref, w1_ref, b1_ref, w2_ref, b2_ref, o_ref):
    # x arrives as f32 straight from HBM; cast to bf16 on the VPU for the MXU.
    x = x_ref[...].astype(jnp.bfloat16)                                  # (TB, 126)
    h = jnp.dot(x, w1_ref[...], preferred_element_type=jnp.float32)      # (TB, 64) f32
    h = jnp.maximum(h + b1_ref[...], 0.0)                                # bias + ReLU in f32
    out = jnp.dot(h.astype(jnp.bfloat16), w2_ref[...],
                  preferred_element_type=jnp.float32)                    # (TB, 24) f32
    o_ref[...] = (out + b2_ref[...]).astype(o_ref.dtype)


def _round_up(n, m):
    return ((n + m - 1) // m) * m


def mlp_forward(x, w1, b1, w2, b2):
    """x: (B, 126) f32; w1: (126, 64); b1: (1, 64); w2: (64, 24); b2: (1, 24)."""
    B = x.shape[0]

    # Only the tiny weights get a dtype pass in the wrapper; x is fed as-is (f32).
    w1_b = w1.astype(jnp.bfloat16)
    w2_b = w2.astype(jnp.bfloat16)
    b1_f = jnp.asarray(b1, jnp.float32)
    b2_f = jnp.asarray(b2, jnp.float32)

    # Batch tile: large enough to amortize per-step overhead, small enough that large
    # batches still give a multi-step grid (>= ~8 steps) for megacore on v7x.
    TB = max(8, min(TB_MAX, _round_up(pl.cdiv(B, 8), 8)))
    grid = (pl.cdiv(B, TB),)   # no batch padding: trailing partial tile is masked by Pallas

    cost = pl.CostEstimate(
        flops=2 * B * (INPUT_SIZE * HIDDEN_SIZE + HIDDEN_SIZE * NUM_CLASSES),
        transcendentals=0,
        bytes_accessed=(B * INPUT_SIZE * 4 + B * NUM_CLASSES * 4
                        + (INPUT_SIZE * HIDDEN_SIZE + HIDDEN_SIZE
                           + HIDDEN_SIZE * NUM_CLASSES + NUM_CLASSES) * 4),
    )

    return pl.pallas_call(
        mlp_kernel,
        out_shape=jax.ShapeDtypeStruct((B, NUM_CLASSES), jnp.float32),
        grid_spec=pltpu.PrefetchScalarGridSpec(
            num_scalar_prefetch=0,
            grid=grid,
            in_specs=[
                pl.BlockSpec((TB, INPUT_SIZE), lambda i: (i, 0)),            # x tile (f32)
                pl.BlockSpec((INPUT_SIZE, HIDDEN_SIZE), lambda i: (0, 0)),   # w1 (VMEM-resident)
                pl.BlockSpec((1, HIDDEN_SIZE), lambda i: (0, 0)),            # b1 (resident)
                pl.BlockSpec((HIDDEN_SIZE, NUM_CLASSES), lambda i: (0, 0)),  # w2 (resident)
                pl.BlockSpec((1, NUM_CLASSES), lambda i: (0, 0)),            # b2 (resident)
            ],
            out_specs=pl.BlockSpec((TB, NUM_CLASSES), lambda i: (i, 0)),     # narrow 24-wide out
        ),
        compiler_params=pltpu.CompilerParams(
            dimension_semantics=("parallel",),
            vmem_limit_bytes=32 * 1024 * 1024,   # explicit headroom (v5e default is 16 MiB)
        ),
        cost_estimate=cost,
    )(x, w1_b, b1_f, w2_b, b2_f)


def init_params(key):
    # Deterministic init mimicking nn.Linear's uniform(-1/sqrt(fan_in), 1/sqrt(fan_in)).
    k1, k2, k3, k4 = jax.random.split(key, 4)
    bound1 = 1.0 / (INPUT_SIZE ** 0.5)
    bound2 = 1.0 / (HIDDEN_SIZE ** 0.5)
    w1 = jax.random.uniform(k1, (INPUT_SIZE, HIDDEN_SIZE), jnp.float32, -bound1, bound1)
    b1 = jax.random.uniform(k2, (1, HIDDEN_SIZE), jnp.float32, -bound1, bound1)
    w2 = jax.random.uniform(k3, (HIDDEN_SIZE, NUM_CLASSES), jnp.float32, -bound2, bound2)
    b2 = jax.random.uniform(k4, (1, NUM_CLASSES), jnp.float32, -bound2, bound2)
    return w1, b1, w2, b2


if __name__ == "__main__":
    key = jax.random.PRNGKey(0)
    kx, kp = jax.random.split(key)

    batch = 8
    x = jax.random.normal(kx, (batch, INPUT_SIZE), jnp.float32)
    w1, b1, w2, b2 = init_params(kp)

    out = mlp_forward(x, w1, b1, w2, b2)
    out = jax.block_until_ready(out)

    # Plain-JAX f32 reference (kernel uses bf16 MXU inputs with f32 accumulation,
    # so allow bf16-level tolerance).
    ref = jnp.maximum(x @ w1 + b1, 0.0) @ w2 + b2
    assert out.shape == (batch, NUM_CLASSES)
    assert jnp.allclose(out, ref, atol=2e-2, rtol=2e-2), float(jnp.max(jnp.abs(out - ref)))

    print("KERNEL_OK")
</pallas_src>

<mosaic_0001>
module attributes {stable_mosaic.version = 11 : i64} {
  func.func @mlp_kernel(%arg0: i32, %arg1: memref<8x126xf32, #tpu.memory_space<vmem>>, %arg2: memref<126x64xbf16, #tpu.memory_space<vmem>>, %arg3: memref<1x64xf32, #tpu.memory_space<vmem>>, %arg4: memref<64x24xbf16, #tpu.memory_space<vmem>>, %arg5: memref<1x24xf32, #tpu.memory_space<vmem>>, %arg6: memref<8x24xf32, #tpu.memory_space<vmem>>) attributes {dimension_semantics = [#tpu.dimension_semantics<parallel>], iteration_bounds = array<i64: 1>, scalar_prefetch = 0 : i64, scratch_operands = 0 : i64, tpu.core_type = #tpu.core_type<tc>, window_params = [{transform_indices = @transform_0, window_bounds = array<i64: 8, 126>}, {pipeline_mode = #tpu.pipeline_mode<synchronous>, transform_indices = @transform_1, window_bounds = array<i64: 126, 64>}, {pipeline_mode = #tpu.pipeline_mode<synchronous>, transform_indices = @transform_2, window_bounds = array<i64: 1, 64>}, {pipeline_mode = #tpu.pipeline_mode<synchronous>, transform_indices = @transform_3, window_bounds = array<i64: 64, 24>}, {pipeline_mode = #tpu.pipeline_mode<synchronous>, transform_indices = @transform_4, window_bounds = array<i64: 1, 24>}, {transform_indices = @transform_5, window_bounds = array<i64: 8, 24>}]} {
    %c0 = arith.constant 0 : index
    %c0_0 = arith.constant 0 : index
    %0 = vector.load %arg1[%c0, %c0_0] : memref<8x126xf32, #tpu.memory_space<vmem>>, vector<8x126xf32>
    %1 = arith.truncf %0 : vector<8x126xf32> to vector<8x126xbf16>
    %c0_1 = arith.constant 0 : index
    %c0_2 = arith.constant 0 : index
    %2 = vector.load %arg2[%c0_1, %c0_2] : memref<126x64xbf16, #tpu.memory_space<vmem>>, vector<126x64xbf16>
    %cst = arith.constant dense<0.000000e+00> : vector<8x64xf32>
    %3 = tpu.matmul %1, %2, %cst {dimension_numbers = #tpu.dot_dimension_numbers<[1], [0], [0], [1], [0, 0, 1, 1], [], []>} : vector<8x126xbf16>, vector<126x64xbf16>, vector<8x64xf32> -> vector<8x64xf32>
    %c0_3 = arith.constant 0 : index
    %c0_4 = arith.constant 0 : index
    %4 = vector.load %arg3[%c0_3, %c0_4] : memref<1x64xf32, #tpu.memory_space<vmem>>, vector<1x64xf32>
    %5 = vector.broadcast %4 : vector<1x64xf32> to vector<8x64xf32>
    %6 = arith.addf %3, %5 : vector<8x64xf32>
    %cst_5 = arith.constant 0.000000e+00 : f32
    %7 = vector.broadcast %cst_5 : f32 to vector<8x64xf32>
    %8 = arith.maximumf %6, %7 : vector<8x64xf32>
    %9 = arith.truncf %8 : vector<8x64xf32> to vector<8x64xbf16>
    %c0_6 = arith.constant 0 : index
    %c0_7 = arith.constant 0 : index
    %10 = vector.load %arg4[%c0_6, %c0_7] : memref<64x24xbf16, #tpu.memory_space<vmem>>, vector<64x24xbf16>
    %cst_8 = arith.constant dense<0.000000e+00> : vector<8x24xf32>
    %11 = tpu.matmul %9, %10, %cst_8 {dimension_numbers = #tpu.dot_dimension_numbers<[1], [0], [0], [1], [0, 0, 1, 1], [], []>} : vector<8x64xbf16>, vector<64x24xbf16>, vector<8x24xf32> -> vector<8x24xf32>
    %c0_9 = arith.constant 0 : index
    %c0_10 = arith.constant 0 : index
    %12 = vector.load %arg5[%c0_9, %c0_10] : memref<1x24xf32, #tpu.memory_space<vmem>>, vector<1x24xf32>
    %13 = vector.broadcast %12 : vector<1x24xf32> to vector<8x24xf32>
    %14 = arith.addf %11, %13 : vector<8x24xf32>
    %c0_11 = arith.constant 0 : index
    %c0_12 = arith.constant 0 : index
    %15 = vector.load %arg6[%c0_11, %c0_12] : memref<8x24xf32, #tpu.memory_space<vmem>>, vector<8x24xf32>
    tpu.vector_store %arg6[%c0_11, %c0_12], %14 {strides = array<i32>} : memref<8x24xf32, #tpu.memory_space<vmem>>, vector<8x24xf32>,
    return
  }
  func.func @transform_0(%arg0: i32) -> (i32, i32) {
    %c0_i32 = arith.constant 0 : i32
    %c0_i32_0 = arith.constant 0 : i32
    return %arg0, %c0_i32 : i32, i32
  }
  func.func @transform_1(%arg0: i32) -> (i32, i32) {
    %c0_i32 = arith.constant 0 : i32
    %c0_i32_0 = arith.constant 0 : i32
    %c0_i32_1 = arith.constant 0 : i32
    return %c0_i32, %c0_i32_0 : i32, i32
  }
  func.func @transform_2(%arg0: i32) -> (i32, i32) {
    %c0_i32 = arith.constant 0 : i32
    %c0_i32_0 = arith.constant 0 : i32
    %c0_i32_1 = arith.constant 0 : i32
    return %c0_i32, %c0_i32_0 : i32, i32
  }
  func.func @transform_3(%arg0: i32) -> (i32, i32) {
    %c0_i32 = arith.constant 0 : i32
    %c0_i32_0 = arith.constant 0 : i32
    %c0_i32_1 = arith.constant 0 : i32
    return %c0_i32, %c0_i32_0 : i32, i32
  }
  func.func @transform_4(%arg0: i32) -> (i32, i32) {
    %c0_i32 = arith.constant 0 : i32
    %c0_i32_0 = arith.constant 0 : i32
    %c0_i32_1 = arith.constant 0 : i32
    return %c0_i32, %c0_i32_0 : i32, i32
  }
  func.func @transform_5(%arg0: i32) -> (i32, i32) {
    %c0_i32 = arith.constant 0 : i32
    %c0_i32_0 = arith.constant 0 : i32
    return %arg0, %c0_i32 : i32, i32
  }
}

</mosaic_0001>

<bundles_post_ra>
// kernel: tpu_custom_call.1
= control target key start
LH: loop header
LB: loop body
LE: loop exit
PB: predicated region body
PF: predicated region fallthrough
CT: control target
= control target key end

     0   :  { %vm95_vm0 = vcmask 1046528   ;;  %s358_s0 = inlined_call_operand.vmem [shape: f32[8,126], index: 0, kind: input, shape index: {}]   ;;  %s359_s1 = inlined_call_operand.vmem [shape: bf16[126,64], index: 1, kind: input, shape index: {}]   ;;  %s360_s2 = inlined_call_operand.vmem [shape: f32[1,64], index: 2, kind: input, shape index: {}]   ;;  %s361_s3 = inlined_call_operand.vmem [shape: bf16[64,24], index: 3, kind: input, shape index: {}]   ;;  %s362_s4 = inlined_call_operand.vmem [shape: f32[1,24], index: 4, kind: input, shape index: {}]   ;;  %s363_s5 = inlined_call_operand.hbm [shape: f32[8,24], index: 5, kind: output, shape index: {}]  }
   0x1   :  { %v215_v0 = vld [vmem:[%s359_s1 + $0x38] sm:$0xf]  ;;  %v242_v1 = vld [vmem:[%s359_s1 + $0x38] sm:$0x70]  ;;  %v241_v5 = vld [vmem:[%s359_s1 + $0x30] sm:$0xff] }
   0x2   :  { %v216_v2 = vor.u32 %v242_v1, %v215_v0  ;;  %v246_v4 = vld [vmem:[%s361_s3 + $0x18] sm:$0xff]  ;;  %v245_v6 = vld [vmem:[%s361_s3 + $0x10] sm:$0xff] }
   0x3   :  { %158 = vmatpush.bf16.msra.mxu1 %v246_v4 }
   0x4   :  { %v97_v3 = vsel %vm95_vm0, %v216_v2, 0 }
   0x5   :  { %99 = vmatpush.bf16.msra.mxu0 %v97_v3 }
   0x6   :  { %10 = vsyncpa [#allocation3], 0  ;;  %v240_v7 = vld [vmem:[%s359_s1 + $0x28] sm:$0xff]  ;;  %v239_v8 = vld [vmem:[%s359_s1 + $0x20] sm:$0xff]  ;;  %vm91_vm1 = vcmask 1031168   ;;  %vm150_vm2 = vcmask 523264  }
   0x7   :  { %159 = vmatpush.bf16.msra.mxu1 %v245_v6  ;;  %v238_v9 = vld [vmem:[%s359_s1 + $0x18] sm:$0xff]  ;;  %v237_v10 = vld [vmem:[%s359_s1 + $0x10] sm:$0xff]  ;;  %v236_v11 = vld [vmem:[%s359_s1 + $0x8] sm:$0xff]  ;;  %s276_s23 = smov [#allocation2]   ;;  %s176_s26 = sshll.u32 %s363_s5, 4  ;;  %vm167_vm3 = vcmask 195584   ;;  %s177_s26 = int_to_ptr.hbm [resolvable:$true] %s176_s26 }
   0x8   :  { %v235_v12 = vld [vmem:[%s359_s1] sm:$0xff]  ;;  %v244_v15 = vld [vmem:[%s361_s3 + $0x8] sm:$0xff]  ;;  %s174_s24 = sshll.u32 %s276_s23, 4  ;;  %s175_s24 = int_to_ptr.vmem [resolvable:$true] %s174_s24 }
   0x9   :  { %100 = vmatpush.bf16.msra.mxu0 %v241_v5  ;;  %v22_v13 = vld [vmem:[%s358_s0] sm:$0xff] }
   0xa   :  { %v23_v14 = vpack.c.bf16 %v22_v13, %v22_v13  ;;  %v243_v16 = vld [vmem:[%s361_s3] sm:$0xff] }
   0xb   :  { %160 = vmatpush.bf16.msra.mxu1 %v244_v15  ;;  %v248_v17 = vld [vmem:[%s360_s2] ss:$0 sm:$0xff] }
   0xc   :  { %v249_v23 = vld [vmem:[%s362_s4] ss:$0 sm:$0xff] }
   0xd   :  { %101 = vmatpush.bf16.msra.mxu0 %v240_v7 }
   0xf   :  { %161 = vmatpush.bf16.msra.mxu1 %v243_v16 }
  0x11   :  { %102 = vmatpush.bf16.msra.mxu0 %v239_v8 }
  0x15   :  { %103 = vmatpush.bf16.msra.mxu0 %v238_v9 }
  0x19   :  { %104 = vmatpush.bf16.msra.mxu0 %v237_v10 }
  0x1d   :  { %105 = vmatpush.bf16.msra.mxu0 %v236_v11 }
  0x21   :  { %106 = vmatpush.bf16.msra.mxu0 %v235_v12 }
  0x24   :  { %217 = vmatmul.msk.bf16.vlgmr.msra.gmra.mxu0 %vm91_vm1, %v23_v14 }
  0xa1   :  { %v108_v18 = vpop.f32.mrf.mxu0 }
  0xa2   :  { %v109_v19 = vadd.f32 %v248_v17, %v108_v18 }
  0xa4   :  { %v112_v20 = vmax.f32 %v109_v19, 0.0 }
  0xa6   :  { %v113_v21 = vpack.c.bf16 %v112_v20, %v112_v20 }
  0xa8   :  { %234 = vmatmul.msk.bf16.vlgmr.msra.gmra.mxu1 %vm150_vm2, %v113_v21 }
  0xa9   :  { %v110_v22 = vpop.f32.mrf.mxu0 }
 0x125   :  { %v163_v24 = vpop.f32.mrf.mxu1 }
 0x126   :  { %v164_v25 = vadd.f32 %v249_v23, %v163_v24 }
 0x128   :  { %168 = vst.msk [vmem:[#allocation2] sm:$0xff] %vm167_vm3, %v164_v25 }
 0x129   :  { %179 = dma.vmem_to_hbm [thread:$0]  %s175_s24, 128, %s177_s26, [#allocation3]  }
 0x12d   :  { %v165_v26 = vpop.f32.mrf.mxu1 }
 0x12e   :  { %274 = dma.done.wait [#allocation3], 128  }
 0x12f   :  { %275 = vsyncadd [#allocation3], 4294967168 }
 0x130   :  { %184 = vsyncpa [#allocation3], 1 }

</bundles_post_ra>
